<compile_context>
chip_gen: v7x
topology: tpu7x:2x2x1
jax: 0.10.0
libtpu: 0.0.40
codegen_flags: <defaults>
</compile_context>

<pallas_src>
import jax
import jax.numpy as jnp
from jax.experimental import pallas as pl
from jax.experimental.pallas import tpu as pltpu


def _round_up(x, m):
    return (x + m - 1) // m * m


def _round_down(x, m):
    return x // m * m


def _largest_divisor_leq(n, cap):
    cap = max(1, min(n, cap))
    for d in range(cap, 0, -1):
        if n % d == 0:
            return d
    return 1


def _vpu_kernel(x_ref, w_ref, b_ref, o_ref):
    # x_ref: (NB, C_in, TP) VMEM;  w_ref: (C_out, C_in) SMEM;  b_ref: (C_out,) SMEM
    # o_ref: (NB, C_out, TP) VMEM
    c_out, c_in = w_ref.shape
    nb, _, tp = x_ref.shape
    x = x_ref[...]                                     # one block load
    rows = []
    for o in range(c_out):                             # static unroll (tiny C_out)
        acc = jnp.zeros((nb, 1, tp), jnp.float32) + b_ref[o]
        for i in range(c_in):                          # static unroll (tiny C_in)
            acc = acc + w_ref[o, i] * x[:, i:i + 1, :].astype(jnp.float32)
        rows.append(acc)
    out = rows[0] if c_out == 1 else jnp.concatenate(rows, axis=1)
    o_ref[...] = out.astype(o_ref.dtype)               # single coalesced store


def _mxu_kernel(x_ref, w_ref, b_ref, o_ref):
    # x_ref: (NB, C_in, TP) VMEM; w_ref: (C_out, C_in) VMEM; b_ref: (C_out, 1) VMEM
    # o_ref: (NB, C_out, TP) VMEM.  NB is ~1 on this (large-channel) path.
    w = w_ref[...]
    b = b_ref[...].astype(jnp.float32)
    nb = x_ref.shape[0]
    for bi in range(nb):                               # static unroll, NB small
        acc = jnp.dot(w, x_ref[bi], preferred_element_type=jnp.float32)
        o_ref[bi] = (acc + b).astype(o_ref.dtype)


def out_conv(x_nchw, weight, bias, *, target_step_bytes=4 << 20,
             vpu_flops_limit=128):
    """1x1 Conv2d forward.

    Args:
      x_nchw: (N, C_in, H, W)
      weight: (C_out, C_in, 1, 1)  -- PyTorch Conv2d weight layout
      bias:   (C_out,)

    Returns:
      (N, C_out, H, W)
    """
    N, C_in, H, W = x_nchw.shape
    C_out = weight.shape[0]
    P = H * W
    in_dt = x_nchw.dtype
    itemsize = jnp.dtype(in_dt).itemsize

    # Generation-aware VMEM capacity (v5e/v6e 128 MiB, v7x 64 MiB per core).
    try:
        vmem_cap = int(pltpu.get_tpu_info().vmem_capacity_bytes)
    except Exception:
        vmem_cap = 64 << 20                        # conservative (v7x) fallback

    w2d = weight.reshape(C_out, C_in)
    # MXU once the per-pixel contraction gets non-trivial (2*Cin*Cout VALU ops
    # per pixel saturate the 4 VALU slots well before C=32).
    use_vpu = (C_in * C_out) <= vpu_flops_limit

    w_bytes = (C_out * C_in + C_out) * itemsize
    # Double-buffered x/out tiles + resident weights must fit comfortably.
    vmem_budget = min(24 << 20, vmem_cap // 2)

    # ---- channel-aware, VMEM-aware pixel tile ------------------------------
    per_pixel_bytes = (C_in + C_out) * itemsize
    tp_target = _round_down(max(128, target_step_bytes // per_pixel_bytes), 128)
    tp_vmem = _round_down(max(0, vmem_budget - w_bytes) // (2 * per_pixel_bytes), 128)
    TP = max(128, min(tp_target, max(tp_vmem, 128)))
    if TP >= P:
        TP = P          # whole pixel axis in one block (equals full array dim)
    # else TP is a multiple of 128; a ragged final pixel block is handled by
    # Pallas block masking (no wrapper-side pad / slice).

    # ---- widen along N when a single image is small ------------------------
    NB = 1
    if TP == P:
        per_image_bytes = max(1, per_pixel_bytes * P)
        nb_target = max(1, min(N, target_step_bytes // per_image_bytes))
        nb_vmem = max(1, max(0, vmem_budget - w_bytes) // (2 * per_image_bytes))
        NB = _largest_divisor_leq(N, min(nb_target, nb_vmem))

    grid = (pl.cdiv(N, NB), pl.cdiv(P, TP))

    x3d = x_nchw.reshape(N, C_in, P)               # free reshape (stays NCHW)

    x_spec = pl.BlockSpec((NB, C_in, TP), lambda n, p: (n, 0, p))
    o_spec = pl.BlockSpec((NB, C_out, TP), lambda n, p: (n, 0, p))

    if use_vpu:
        kernel = _vpu_kernel
        w_arg = w2d.astype(jnp.float32)
        b_arg = bias.astype(jnp.float32)
        w_spec = pl.BlockSpec(memory_space=pltpu.MemorySpace.SMEM)
        b_spec = pl.BlockSpec(memory_space=pltpu.MemorySpace.SMEM)
    else:
        kernel = _mxu_kernel
        w_arg = w2d.astype(in_dt)                  # match MXU operand dtypes
        b_arg = bias.astype(jnp.float32).reshape(C_out, 1)
        # Weights stay VMEM-resident across the grid (constant index_map).
        # For multi-MiB C_out*C_in one would tile C_out on a third grid axis;
        # irrelevant for OutConv's small channel counts.
        w_spec = pl.BlockSpec((C_out, C_in), lambda n, p: (0, 0))
        b_spec = pl.BlockSpec((C_out, 1), lambda n, p: (0, 0))

    # Raise scoped VMEM (v5e default is only 16 MiB) to cover the
    # double-buffered tiles, staying well under physical capacity.
    tile_bytes = NB * (C_in + C_out) * TP * itemsize
    vmem_needed = 2 * tile_bytes + w_bytes + (1 << 20)
    vmem_limit = int(min(max(2 * vmem_needed, 32 << 20), int(vmem_cap * 0.7)))

    cost = pl.CostEstimate(
        flops=2 * N * P * C_in * C_out,
        transcendentals=0,
        bytes_accessed=N * P * (C_in + C_out) * itemsize + w_bytes,
    )

    out3d = pl.pallas_call(
        kernel,
        out_shape=jax.ShapeDtypeStruct((N, C_out, P), in_dt),
        grid_spec=pltpu.PrefetchScalarGridSpec(
            num_scalar_prefetch=0,
            grid=grid,
            in_specs=[x_spec, w_spec, b_spec],
            out_specs=o_spec,
        ),
        compiler_params=pltpu.CompilerParams(
            dimension_semantics=("parallel", "parallel"),
            vmem_limit_bytes=vmem_limit),
        cost_estimate=cost,
    )(x3d, w_arg, b_arg)

    return out3d.reshape(N, C_out, H, W)


if __name__ == "__main__":
    key = jax.random.PRNGKey(0)
    kx, kw, kb, kx2, kw2, kb2 = jax.random.split(key, 6)

    # --- small-channel case (VPU path), the typical OutConv shape ----------
    N, C_in, C_out, H, W = 2, 4, 2, 16, 16
    x = jax.random.normal(kx, (N, C_in, H, W), dtype=jnp.float32)
    weight = jax.random.normal(kw, (C_out, C_in, 1, 1), dtype=jnp.float32) * 0.1
    bias = jax.random.normal(kb, (C_out,), dtype=jnp.float32) * 0.1

    y = jax.block_until_ready(out_conv(x, weight, bias))
    ref = jnp.einsum("nihw,oi->nohw", x, weight.reshape(C_out, C_in)) \
          + bias.reshape(1, C_out, 1, 1)
    assert y.shape == (N, C_out, H, W)
    assert jnp.allclose(y, ref, atol=1e-5, rtol=1e-5)

    # --- larger-channel case (MXU path) -------------------------------------
    C_in2, C_out2 = 32, 8
    x2 = jax.random.normal(kx2, (N, C_in2, H, W), dtype=jnp.float32)
    weight2 = jax.random.normal(kw2, (C_out2, C_in2, 1, 1), dtype=jnp.float32) * 0.1
    bias2 = jax.random.normal(kb2, (C_out2,), dtype=jnp.float32) * 0.1

    y2 = jax.block_until_ready(out_conv(x2, weight2, bias2))
    ref2 = jnp.einsum("nihw,oi->nohw", x2, weight2.reshape(C_out2, C_in2)) \
           + bias2.reshape(1, C_out2, 1, 1)
    assert y2.shape == (N, C_out2, H, W)
    assert jnp.allclose(y2, ref2, atol=1e-4, rtol=1e-4)

    print("KERNEL_OK")
</pallas_src>

<mosaic_0001>
module attributes {stable_mosaic.version = 11 : i64} {
  func.func @_vpu_kernel(%arg0: i32, %arg1: i32, %arg2: memref<2x4x256xf32, #tpu.memory_space<vmem>>, %arg3: memref<2x4xf32, #tpu.memory_space<smem>>, %arg4: memref<2xf32, #tpu.memory_space<smem>>, %arg5: memref<2x2x256xf32, #tpu.memory_space<vmem>>) attributes {dimension_semantics = [#tpu.dimension_semantics<parallel>, #tpu.dimension_semantics<parallel>], iteration_bounds = array<i64: 1, 1>, scalar_prefetch = 0 : i64, scratch_operands = 0 : i64, tpu.core_type = #tpu.core_type<tc>, window_params = [{transform_indices = @transform_0, window_bounds = array<i64: 2, 4, 256>}, {transform_indices = @transform_1, window_bounds = array<i64: 2, 4>}, {transform_indices = @transform_2, window_bounds = array<i64: 2>}, {transform_indices = @transform_3, window_bounds = array<i64: 2, 2, 256>}]} {
    %c0 = arith.constant 0 : index
    %c0_0 = arith.constant 0 : index
    %c0_1 = arith.constant 0 : index
    %0 = vector.load %arg2[%c0, %c0_0, %c0_1] : memref<2x4x256xf32, #tpu.memory_space<vmem>>, vector<2x4x256xf32>
    %cst = arith.constant 0.000000e+00 : f32
    %1 = vector.broadcast %cst : f32 to vector<2x1x256xf32>
    %c0_2 = arith.constant 0 : index
    %2 = memref.load %arg4[%c0_2] : memref<2xf32, #tpu.memory_space<smem>>
    %3 = vector.broadcast %2 : f32 to vector<2x1x256xf32>
    %4 = arith.addf %1, %3 : vector<2x1x256xf32>
    %c0_3 = arith.constant 0 : index
    %c0_4 = arith.constant 0 : index
    %5 = memref.load %arg3[%c0_3, %c0_4] : memref<2x4xf32, #tpu.memory_space<smem>>
    %6 = vector.extract_strided_slice %0 {offsets = [0, 0, 0], sizes = [2, 1, 256], strides = [1, 1, 1]} : vector<2x4x256xf32> to vector<2x1x256xf32>
    %7 = vector.broadcast %5 : f32 to vector<2x1x256xf32>
    %8 = arith.mulf %7, %6 : vector<2x1x256xf32>
    %9 = arith.addf %4, %8 : vector<2x1x256xf32>
    %c0_5 = arith.constant 0 : index
    %c1 = arith.constant 1 : index
    %10 = memref.load %arg3[%c0_5, %c1] : memref<2x4xf32, #tpu.memory_space<smem>>
    %11 = vector.extract_strided_slice %0 {offsets = [0, 1, 0], sizes = [2, 1, 256], strides = [1, 1, 1]} : vector<2x4x256xf32> to vector<2x1x256xf32>
    %12 = vector.broadcast %10 : f32 to vector<2x1x256xf32>
    %13 = arith.mulf %12, %11 : vector<2x1x256xf32>
    %14 = arith.addf %9, %13 : vector<2x1x256xf32>
    %c0_6 = arith.constant 0 : index
    %c2 = arith.constant 2 : index
    %15 = memref.load %arg3[%c0_6, %c2] : memref<2x4xf32, #tpu.memory_space<smem>>
    %16 = vector.extract_strided_slice %0 {offsets = [0, 2, 0], sizes = [2, 1, 256], strides = [1, 1, 1]} : vector<2x4x256xf32> to vector<2x1x256xf32>
    %17 = vector.broadcast %15 : f32 to vector<2x1x256xf32>
    %18 = arith.mulf %17, %16 : vector<2x1x256xf32>
    %19 = arith.addf %14, %18 : vector<2x1x256xf32>
    %c0_7 = arith.constant 0 : index
    %c3 = arith.constant 3 : index
    %20 = memref.load %arg3[%c0_7, %c3] : memref<2x4xf32, #tpu.memory_space<smem>>
    %21 = vector.extract_strided_slice %0 {offsets = [0, 3, 0], sizes = [2, 1, 256], strides = [1, 1, 1]} : vector<2x4x256xf32> to vector<2x1x256xf32>
    %22 = vector.broadcast %20 : f32 to vector<2x1x256xf32>
    %23 = arith.mulf %22, %21 : vector<2x1x256xf32>
    %24 = arith.addf %19, %23 : vector<2x1x256xf32>
    %cst_8 = arith.constant 0.000000e+00 : f32
    %25 = vector.broadcast %cst_8 : f32 to vector<2x1x256xf32>
    %c1_9 = arith.constant 1 : index
    %26 = memref.load %arg4[%c1_9] : memref<2xf32, #tpu.memory_space<smem>>
    %27 = vector.broadcast %26 : f32 to vector<2x1x256xf32>
    %28 = arith.addf %25, %27 : vector<2x1x256xf32>
    %c1_10 = arith.constant 1 : index
    %c0_11 = arith.constant 0 : index
    %29 = memref.load %arg3[%c1_10, %c0_11] : memref<2x4xf32, #tpu.memory_space<smem>>
    %30 = vector.extract_strided_slice %0 {offsets = [0, 0, 0], sizes = [2, 1, 256], strides = [1, 1, 1]} : vector<2x4x256xf32> to vector<2x1x256xf32>
    %31 = vector.broadcast %29 : f32 to vector<2x1x256xf32>
    %32 = arith.mulf %31, %30 : vector<2x1x256xf32>
    %33 = arith.addf %28, %32 : vector<2x1x256xf32>
    %c1_12 = arith.constant 1 : index
    %c1_13 = arith.constant 1 : index
    %34 = memref.load %arg3[%c1_12, %c1_13] : memref<2x4xf32, #tpu.memory_space<smem>>
    %35 = vector.extract_strided_slice %0 {offsets = [0, 1, 0], sizes = [2, 1, 256], strides = [1, 1, 1]} : vector<2x4x256xf32> to vector<2x1x256xf32>
    %36 = vector.broadcast %34 : f32 to vector<2x1x256xf32>
    %37 = arith.mulf %36, %35 : vector<2x1x256xf32>
    %38 = arith.addf %33, %37 : vector<2x1x256xf32>
    %c1_14 = arith.constant 1 : index
    %c2_15 = arith.constant 2 : index
    %39 = memref.load %arg3[%c1_14, %c2_15] : memref<2x4xf32, #tpu.memory_space<smem>>
    %40 = vector.extract_strided_slice %0 {offsets = [0, 2, 0], sizes = [2, 1, 256], strides = [1, 1, 1]} : vector<2x4x256xf32> to vector<2x1x256xf32>
    %41 = vector.broadcast %39 : f32 to vector<2x1x256xf32>
    %42 = arith.mulf %41, %40 : vector<2x1x256xf32>
    %43 = arith.addf %38, %42 : vector<2x1x256xf32>
    %c1_16 = arith.constant 1 : index
    %c3_17 = arith.constant 3 : index
    %44 = memref.load %arg3[%c1_16, %c3_17] : memref<2x4xf32, #tpu.memory_space<smem>>
    %45 = vector.extract_strided_slice %0 {offsets = [0, 3, 0], sizes = [2, 1, 256], strides = [1, 1, 1]} : vector<2x4x256xf32> to vector<2x1x256xf32>
    %46 = vector.broadcast %44 : f32 to vector<2x1x256xf32>
    %47 = arith.mulf %46, %45 : vector<2x1x256xf32>
    %48 = arith.addf %43, %47 : vector<2x1x256xf32>
    %49 = tpu.concatenate %24, %48 in 1 : vector<2x1x256xf32>, vector<2x1x256xf32> -> vector<2x2x256xf32>
    %c0_18 = arith.constant 0 : index
    %c0_19 = arith.constant 0 : index
    %c0_20 = arith.constant 0 : index
    %50 = vector.load %arg5[%c0_18, %c0_19, %c0_20] : memref<2x2x256xf32, #tpu.memory_space<vmem>>, vector<2x2x256xf32>
    tpu.vector_store %arg5[%c0_18, %c0_19, %c0_20], %49 {strides = array<i32>} : memref<2x2x256xf32, #tpu.memory_space<vmem>>, vector<2x2x256xf32>,
    return
  }
  func.func @transform_0(%arg0: i32, %arg1: i32) -> (i32, i32, i32) {
    %c0_i32 = arith.constant 0 : i32
    %c0_i32_0 = arith.constant 0 : i32
    return %arg0, %c0_i32, %arg1 : i32, i32, i32
  }
  func.func @transform_1(%arg0: i32, %arg1: i32) -> (i32, i32) {
    %c0_i32 = arith.constant 0 : i32
    %c0_i32_0 = arith.constant 0 : i32
    %c0_i32_1 = arith.constant 0 : i32
    return %c0_i32, %c0_i32_0 : i32, i32
  }
  func.func @transform_2(%arg0: i32, %arg1: i32) -> i32 {
    %c0_i32 = arith.constant 0 : i32
    %c0_i32_0 = arith.constant 0 : i32
    return %c0_i32 : i32
  }
  func.func @transform_3(%arg0: i32, %arg1: i32) -> (i32, i32, i32) {
    %c0_i32 = arith.constant 0 : i32
    %c0_i32_0 = arith.constant 0 : i32
    return %arg0, %c0_i32, %arg1 : i32, i32, i32
  }
}

</mosaic_0001>

<bundles_post_ra>
// kernel: tpu_custom_call.1
= control target key start
LH: loop header
LB: loop body
LE: loop exit
PB: predicated region body
PF: predicated region fallthrough
CT: control target
= control target key end

     0   :  { %8 = vsyncpa [#allocation3], 0  ;;  %s457_s0 = inlined_call_operand.hbm [shape: f32[2,4,256], index: 0, kind: input, shape index: {}]   ;;  %s458_s1 = inlined_call_operand.vmem [shape: f32[2,4], index: 1, kind: input, shape index: {}]   ;;  %s459_s2 = inlined_call_operand.vmem [shape: f32[2], index: 2, kind: input, shape index: {}]   ;;  %s460_s3 = inlined_call_operand.hbm [shape: f32[2,2,256], index: 3, kind: output, shape index: {}]  }
   0x1   :  { %9 = vsyncpa [#allocation5], 0 }
   0x2   :  { %10 = vsyncpa [#allocation8], 0 }
   0x3   :  { %11 = vsyncpa [#allocation4], 0  ;;  %s356_s12 = smov [#allocation2]   ;;  %s30_s16 = sshll.u32 %s458_s1, 4  ;;  %s31_s16 = int_to_ptr.vmem [resolvable:$true] %s30_s16 }
   0x4   :  { %s17_s13 = sshll.u32 %s356_s12, 4  ;;  %s280_s19 = scalar_lea.hbm %s457_s0, 256  ;;  %s18_s13 = int_to_ptr.vmem [resolvable:$true] %s17_s13 }
   0x5   :  { %p281_p0 = scmp.ne.s32.totalorder %s457_s0, %s280_s19  ;;  %p284_p1 = scmp.lt.u32.totalorder %s280_s19, %s457_s0 }
   0x7   :  { %p286_p2 = pnand %p284_p1, %p281_p0 }
   0x9   :  { %289 = shalt.err (!%p286_p2)
}
   0xa   :  { %s290_s24 = scalar_lea.vmem %s18_s13, 256  ;;  %p295_p4 = scmp.lt.s32.totalorder %s18_s13, %s18_s13 }
   0xb   :  { %p291_p3 = scmp.ne.s32.totalorder %s18_s13, %s290_s24  ;;  %p296_p5 = scmp.lt.s32.totalorder %s290_s24, %s290_s24 }
   0xd   :  { %p297_p6 = por %p296_p5, %p295_p4 }
   0xf   :  { %p298_p7 = pnand %p297_p6, %p291_p3 }
  0x11   :  { %301 = shalt.err (!%p298_p7)
}
  0x12   :  { %s357_s1 = smov 128   ;;  %s358_s25 = smov 8  }
  0x13   :  { %23 = dma.hbm_to_vmem [thread:$0]  %s457_s0, 256, %s18_s13, [#allocation3], %s357_s1, %s357_s1, %s358_s25  }
  0x14   :  { %s302_s28 = scalar_lea.vmem %s31_s16, 32  ;;  %p307_p9 = scmp.lt.s32.totalorder %s31_s16, %s31_s16 }
  0x15   :  { %p303_p8 = scmp.ne.s32.totalorder %s31_s16, %s302_s28  ;;  %p308_p10 = scmp.lt.s32.totalorder %s302_s28, %s302_s28 }
  0x17   :  { %p309_p11 = por %p308_p10, %p307_p9 }
  0x19   :  { %p310_p12 = pnand %p309_p11, %p303_p8 }
  0x1b   :  { %313 = shalt.err (!%p310_p12)
}
  0x1c   :  { %s359_s29 = smov [#allocation6]   ;;  %s40_s5 = sshll.u32 %s459_s2, 4  ;;  %s41_s5 = int_to_ptr.vmem [resolvable:$true] %s40_s5 }
  0x1d   :  { %33 = dma.vmem_to_smem %s31_s16, 32, %s359_s29, [#allocation5]  }
  0x1e   :  { %s314_s6 = scalar_lea.vmem %s41_s5, 16  ;;  %p319_p0 = scmp.lt.s32.totalorder %s41_s5, %s41_s5 }
  0x1f   :  { %p315_p13 = scmp.ne.s32.totalorder %s41_s5, %s314_s6  ;;  %p320_p1 = scmp.lt.s32.totalorder %s314_s6, %s314_s6 }
  0x21   :  { %p321_p2 = por %p320_p1, %p319_p0 }
  0x23   :  { %p322_p3 = pnand %p321_p2, %p315_p13 }
  0x25   :  { %325 = shalt.err (!%p322_p3)
}
  0x26   :  { %s360_s0 = smov [#allocation7]  }
  0x27   :  { %43 = dma.vmem_to_smem %s41_s5, 16, %s360_s0, [#allocation8]  }
  0x28   :  { %348 = dma.done.wait [#allocation3], 256  }
  0x29   :  { %349 = vsyncadd [#allocation3], 4294967040 }
  0x2a   :  { %350 = dma.done.wait [#allocation5], 32  }
  0x2b   :  { %351 = vsyncadd [#allocation5], 4294967264 }
  0x2c   :  { %352 = dma.done.wait [#allocation8], 16  }
  0x2d   :  { %353 = vsyncadd [#allocation8], 4294967280 }
  0x2e   :  { %53 = sfence }
  0x2f   :  { %s402_s7 = sld [smem:[#allocation7]]  ;;  %v160_v0 = vlaneseq  ;;  %s404_s8 = sld [smem:[#allocation6 + $0x1]]  ;;  %v54_v2 = vld [vmem:[#allocation2] sm:$0xff]  ;;  %v55_v3 = vld [vmem:[#allocation2 + $0x8] sm:$0xff]  ;;  %vm202_vm0 = vcmask 1040384  }
  0x30   :  { %s59_s2 = sld [smem:[#allocation6]]  ;;  %s406_s9 = sld [smem:[#allocation6 + $0x2]] }
  0x31   :  { %s408_s10 = sld [smem:[#allocation6 + $0x3]]  ;;  %s410_s11 = sld [smem:[#allocation7 + $0x1]]  ;;  %v161_v1 = vshrl.u32 %v160_v0, 7 }
  0x32   :  { %s412_s12 = sld [smem:[#allocation6 + $0x80]]  ;;  %s414_s13 = sld [smem:[#allocation6 + $0x81]] }
  0x33   :  { %s416_s14 = sld [smem:[#allocation6 + $0x82]]  ;;  %s418_s15 = sld [smem:[#allocation6 + $0x83]]  ;;  %v421_v6 = vsub.s32 0, %v161_v1  ;;  %v423_v7 = vsub.s32 4, %v161_v1 }
  0x34   :  { %s361_s16 = smov [#allocation9]  }
  0x35   :  { %v57_v4 = vstv %s402_s7  ;;  %v66_v9 = vstv %s404_s8  ;;  %s236_s17 = sshll.u32 %s361_s16, 4  ;;  %s237_s17 = int_to_ptr.vmem [resolvable:$true] %s236_s17 }
  0x36   :  { %v60_v5 = vstv %s59_s2  ;;  %v80_v10 = vstv %s406_s9  ;;  %v67_v12 = vmul.f32 %v66_v9, %v54_v2  ;;  %v68_v33 = vmul.f32 %v66_v9, %v55_v3  ;;  %s326_s18 = scalar_lea.vmem %s237_s17, 128  ;;  %p331_p5 = scmp.lt.s32.totalorder %s237_s17, %s237_s17 }
  0x37   :  { %v61_v8 = vmul.f32 %v60_v5, %v54_v2  ;;  %v62_v11 = vmul.f32 %v60_v5, %v55_v3  ;;  %v81_v13 = vmul.f32 %v80_v10, %v54_v2  ;;  %v94_v14 = vstv %s408_s10  ;;  %p327_p4 = scmp.ne.s32.totalorder %s237_s17, %s326_s18  ;;  %p332_p6 = scmp.lt.s32.totalorder %s326_s18, %s326_s18 }
  0x38   :  { %v108_v15 = vstv %s410_s11  ;;  %v95_v17 = vmul.f32 %v94_v14, %v54_v2  ;;  %v111_v18 = vstv %s412_s12  ;;  %v117_v19 = vstv %s414_s13 }
  0x39   :  { %v63_v16 = vadd.f32 %v61_v8, %v57_v4  ;;  %v251_v20 = vrot.slane %v67_v12, 9  ;;  %v254_v21 = vrot.slane %v81_v13, 10  ;;  %v112_v22 = vmul.f32 %v111_v18, %v54_v2  ;;  %p333_p7 = por %p332_p6, %p331_p5 }
  0x3a   :  { %v118_v23 = vmul.f32 %v117_v19, %v54_v2  ;;  %v257_v24 = vrot.slane %v95_v17, 11  ;;  %v131_v25 = vstv %s416_s14  ;;  %v145_v26 = vstv %s418_s15 }
  0x3b   :  { %v64_v27 = vadd.f32 %v62_v11, %v57_v4  ;;  %v77_v28 = vadd.f32 %v251_v20, %v63_v16  ;;  %v114_v29 = vadd.f32 %v112_v22, %v108_v15  ;;  %v132_v31 = vmul.f32 %v131_v25, %v54_v2  ;;  %p334_p8 = pnand %p333_p7, %p327_p4 }
  0x3c   :  { %v262_v30 = vrot.slane %v118_v23, 9  ;;  %v146_v32 = vmul.f32 %v145_v26, %v54_v2  ;;  %v82_v34 = vmul.f32 %v80_v10, %v55_v3  ;;  %v96_v35 = vmul.f32 %v94_v14, %v55_v3 }
  0x3d   :  { %v91_v36 = vadd.f32 %v254_v21, %v77_v28  ;;  %v265_v38 = vrot.slane %v132_v31, 10  ;;  %v113_v39 = vmul.f32 %v111_v18, %v55_v3  ;;  %v252_v41 = vrot.slane %v68_v33, 9 }
  0x3e   :  { %v128_v37 = vadd.f32 %v262_v30, %v114_v29  ;;  %v268_v40 = vrot.slane %v146_v32, 11  ;;  %v255_v42 = vrot.slane %v82_v34, 10  ;;  %v119_v46 = vmul.f32 %v117_v19, %v55_v3 }
  0x3f   :  { %v105_v43 = vadd.f32 %v257_v24, %v91_v36  ;;  %v115_v45 = vadd.f32 %v113_v39, %v108_v15  ;;  %v78_v47 = vadd.f32 %v252_v41, %v64_v27  ;;  %v258_v48 = vrot.slane %v96_v35, 11 }
  0x40   :  { %v142_v44 = vadd.f32 %v265_v38, %v128_v37  ;;  %v133_v49 = vmul.f32 %v131_v25, %v55_v3  ;;  %v147_v50 = vmul.f32 %v145_v26, %v55_v3  ;;  %v263_v54 = vrot.slane %v119_v46, 9 }
  0x41   :  { %v163_v52 = vrot.slane %v105_v43, %v421_v6  ;;  %v167_v53 = vrot.slane %v105_v43, %v423_v7  ;;  %v92_v55 = vadd.f32 %v255_v42, %v78_v47 }
  0x42   :  { %v156_v51 = vadd.f32 %v268_v40, %v142_v44  ;;  %v266_v56 = vrot.slane %v133_v49, 10  ;;  %v129_v59 = vadd.f32 %v263_v54, %v115_v45  ;;  %v269_v60 = vrot.slane %v147_v50, 11 }
  0x43   :  { %v106_v61 = vadd.f32 %v258_v48, %v92_v55 }
  0x44   :  { %v185_v57 = vrot.slane %v156_v51, %v421_v6  ;;  %v189_v58 = vrot.slane %v156_v51, %v423_v7  ;;  %v143_v0 = vadd.f32 %v266_v56, %v129_v59 }
  0x45   :  { %v171_v3 = vrot.slane %v106_v61, %v421_v6  ;;  %v175_v4 = vrot.slane %v106_v61, %v423_v7 }
  0x46   :  { %v203_v62 = vsel %vm202_vm0, %v163_v52, %v185_v57  ;;  %v204_v63 = vsel %vm202_vm0, %v167_v53, %v189_v58  ;;  %v157_v2 = vadd.f32 %v269_v60, %v143_v0 }
  0x47   :  { %v211_v1 = vcombine.low %v203_v62, %v204_v63 }
  0x48   :  { %v193_v5 = vrot.slane %v157_v2, %v421_v6  ;;  %v197_v8 = vrot.slane %v157_v2, %v423_v7 }
  0x49   :  { %270 = vst.sshfl [vmem:[#allocation9] sm:$0x33 pattern:$0x76325410] %v211_v1 }
  0x4a   :  { %v205_v9 = vsel %vm202_vm0, %v171_v3, %v193_v5  ;;  %v206_v10 = vsel %vm202_vm0, %v175_v4, %v197_v8 }
  0x4b   :  { %v219_v11 = vcombine.low %v205_v9, %v206_v10 }
  0x4d   :  { %271 = vst.sshfl [vmem:[#allocation9 + $0x4] sm:$0x33 pattern:$0x76325410] %v219_v11 }
  0x4e   :  { %337 = shalt.err (!%p334_p8)
}
  0x4f   :  { %s338_s21 = scalar_lea.hbm %s460_s3, 128 }
  0x50   :  { %p339_p9 = scmp.ne.s32.totalorder %s460_s3, %s338_s21  ;;  %p342_p10 = scmp.lt.u32.totalorder %s338_s21, %s460_s3 }
  0x52   :  { %p344_p11 = pnand %p342_p10, %p339_p9 }
  0x54   :  { %347 = shalt.err (!%p344_p11)
}
  0x55   :  { %s362_s25 = smov 64   ;;  %s363_s26 = smov 4  }
  0x56   :  { %242 = dma.vmem_to_hbm [thread:$0]  %s237_s17, 128, %s460_s3, [#allocation4], %s362_s25, %s362_s25, %s363_s26  }
  0x57   :  { %354 = dma.done.wait [#allocation4], 128  }
  0x58   :  { %355 = vsyncadd [#allocation4], 4294967168 }
  0x59   :  { %246 = vsyncpa [#allocation3], 1 }
  0x5a   :  { %247 = vsyncpa [#allocation4], 1 }
  0x5b   :  { %248 = vsyncpa [#allocation5], 1 }
  0x5c   :  { %249 = vsyncpa [#allocation8], 1 }

</bundles_post_ra>
